<compile_context>
chip_gen: v7x
topology: tpu7x:2x2x1
jax: 0.10.0
libtpu: 0.0.40
codegen_flags: <defaults>
</compile_context>

<pallas_src>
import jax
import jax.numpy as jnp
from jax import lax
from jax.experimental import pallas as pl
from jax.experimental.pallas import tpu as pltpu


def _round_up(n, m):
    return ((n + m - 1) // m) * m


# ----------------------------------------------------------------------------
# Tile selection
# ----------------------------------------------------------------------------
def _pick_tile(batch, max_b_tile):
    """Pick the batch tile (lanes).

    - multiple of 128 lanes, as large as possible (<= max_b_tile)
    - keep >= 2 grid steps whenever the batch allows, so v7x megacore can shard
      the "parallel" axis across its two TensorCores
    - b_pad is rounded up to a multiple of the tile (padding <= bt-1 samples)
    """
    max_b_tile = max(128, (max_b_tile // 128) * 128)
    b128 = _round_up(max(batch, 1), 128)
    if b128 <= 128:
        bt = 128
    else:
        bt = max(128, min(max_b_tile, ((b128 // 2) // 128) * 128))
    b_pad = _round_up(b128, bt)
    return bt, b_pad


# ----------------------------------------------------------------------------
# Kernel
# ----------------------------------------------------------------------------
def make_rtn_kernel(in_channels, compressed_dim, f_pad):
    C, D, F = in_channels, compressed_dim, f_pad
    scale = float(in_channels ** 2)
    bf16 = jnp.bfloat16

    def rtn_kernel(xn_ref, w_ref, b_ref, out_ref):
        # --- static slab views (weights already bf16, biases f32) ---
        w1 = w_ref[0 * F:0 * F + C, 0:C]                 # (C, C) bf16
        w2 = w_ref[1 * F:1 * F + D, 0:C]                 # (D, C) bf16
        w3 = w_ref[2 * F:2 * F + D, 0:D]                 # (D, D) bf16
        w4 = w_ref[3 * F:3 * F + C, 0:D]                 # (C, D) bf16
        b1 = b_ref[0 * F:0 * F + C, :]                   # (C, 1) f32
        b2 = b_ref[1 * F:1 * F + D, :]                   # (D, 1) f32
        b3 = b_ref[2 * F:2 * F + D, :]                   # (D, 1) f32
        b4 = b_ref[3 * F:3 * F + C, :]                   # (C, 1) f32

        # streamed slab: rows [0, C) = x, rows [C, C+D) = channel noise
        x = xn_ref[0:C, :]                               # (C, BT) bf16, batch on lanes
        noise = xn_ref[C:C + D, :].astype(jnp.float32)   # (D, BT) f32

        # ---- encoder: Linear -> ReLU -> Linear (y = W @ x + b, feature-major) ----
        h = jnp.dot(w1, x, preferred_element_type=jnp.float32) + b1
        h = jnp.maximum(h, 0.0)
        z = jnp.dot(w2, h.astype(bf16), preferred_element_type=jnp.float32) + b2

        # ---- in_channels**2 * z / ||z||_2  (L2 over features = sublane reduce) ----
        # No epsilon, matching torch `x / x.norm(dim=-1)[:, None]`.  Padded batch
        # columns are independent; a zero-norm padded column cannot pollute real
        # outputs.
        sumsq = jnp.sum(z * z, axis=0, keepdims=True)    # (1, BT)
        z = z * (scale * lax.rsqrt(sumsq))

        # ---- add channel noise ----
        z = z + noise

        # ---- decoder: Linear -> ReLU -> Linear ----
        d = jnp.dot(w3, z.astype(bf16), preferred_element_type=jnp.float32) + b3
        d = jnp.maximum(d, 0.0)
        out = jnp.dot(w4, d.astype(bf16), preferred_element_type=jnp.float32) + b4

        out_ref[...] = out.astype(out_ref.dtype)

    return rtn_kernel


# ----------------------------------------------------------------------------
# Wrapper
# ----------------------------------------------------------------------------
def radio_transformer_forward(x, noise, w_slab, b_slab,
                              in_channels, compressed_dim, *, max_b_tile=8192):
    """x: (batch, in_channels), noise: (batch, compressed_dim) -> (batch, in_channels).

    max_b_tile: largest batch tile (lanes).  8192 keeps double-buffered bf16
    streams + f32 intermediates well inside the default scoped VMEM on every
    generation (incl. v5e's 16 MiB); on v6e/v7x it can be raised to 16384+
    (pair with pltpu.CompilerParams(vmem_limit_bytes=...) if pushed further).
    """
    C, D = in_channels, compressed_dim
    F = w_slab.shape[1]
    batch = x.shape[0]
    bt, b_pad = _pick_tile(batch, max_b_tile)

    # Wrapper-side layout plumbing: batch on lanes, features on sublanes, bf16
    # stream, x and noise packed into one slab (one DMA chain per grid step).
    xn = jnp.concatenate([x, noise], axis=1).astype(jnp.bfloat16).T     # (C+D, batch)
    xn_t = jnp.zeros((C + D, b_pad), jnp.bfloat16).at[:, :batch].set(xn)

    kernel = make_rtn_kernel(C, D, F)

    out_t = pl.pallas_call(
        kernel,
        out_shape=jax.ShapeDtypeStruct((C, b_pad), jnp.bfloat16),
        grid=(b_pad // bt,),
        in_specs=[
            pl.BlockSpec((C + D, bt), lambda b: (0, b)),     # x+noise stream (bf16)
            pl.BlockSpec(w_slab.shape, lambda b: (0, 0)),    # VMEM-resident bf16 weights
            pl.BlockSpec(b_slab.shape, lambda b: (0, 0)),    # VMEM-resident f32 biases
        ],
        out_specs=pl.BlockSpec((C, bt), lambda b: (0, b)),
        compiler_params=pltpu.CompilerParams(
            dimension_semantics=("parallel",)),              # megacore on v7x
    )(xn_t, w_slab, b_slab)

    return out_t[:, :batch].T.astype(jnp.float32)


# ----------------------------------------------------------------------------
# Parameters
# ----------------------------------------------------------------------------
def init_params(key, in_channels, compressed_dim):
    """PyTorch-Linear-like uniform init; weights stored (out_features, in_features)."""
    ks = jax.random.split(key, 8)

    def lin(kw, kb, fan_in, fan_out):
        bound = 1.0 / (fan_in ** 0.5)
        w = jax.random.uniform(kw, (fan_out, fan_in), jnp.float32, -bound, bound)
        b = jax.random.uniform(kb, (fan_out,), jnp.float32, -bound, bound)
        return w, b

    w1, b1 = lin(ks[0], ks[1], in_channels, in_channels)
    w2, b2 = lin(ks[2], ks[3], in_channels, compressed_dim)
    w3, b3 = lin(ks[4], ks[5], compressed_dim, compressed_dim)
    w4, b4 = lin(ks[6], ks[7], compressed_dim, in_channels)
    return (w1, b1, w2, b2, w3, b3, w4, b4)


def pack_params(params, in_channels, compressed_dim):
    """Pack the 4 weights into one bf16 (4F, F) slab and the 4 biases into f32 (4F, 1).

    F is a multiple of 16 so each weight's slab row-offset is aligned to the
    bf16 sublane packing.
    """
    C, D = in_channels, compressed_dim
    F = _round_up(max(C, D), 16)
    w_slab = jnp.zeros((4 * F, F), jnp.float32)
    b_slab = jnp.zeros((4 * F, 1), jnp.float32)
    for k, (w, b) in enumerate(zip(params[0::2], params[1::2])):
        o, i = w.shape
        w_slab = w_slab.at[k * F:k * F + o, :i].set(w)
        b_slab = b_slab.at[k * F:k * F + o, 0].set(b)
    return w_slab.astype(jnp.bfloat16), b_slab


# ----------------------------------------------------------------------------
# Pure-JAX reference (mirrors the PyTorch forward; same bf16 stream / operand
# rounding and f32 accumulation as the kernel so the comparison is tight).
# ----------------------------------------------------------------------------
def reference_forward(x, noise, params, in_channels):
    w1, b1, w2, b2, w3, b3, w4, b4 = params
    bf16 = jnp.bfloat16

    def lin(a, w, b):
        return jnp.dot(a.astype(bf16), w.astype(bf16).T,
                       preferred_element_type=jnp.float32) + b

    h = jnp.maximum(lin(x, w1, b1), 0.0)
    z = lin(h, w2, b2)
    z = (in_channels ** 2) * (z * lax.rsqrt(jnp.sum(z * z, -1, keepdims=True)))
    z = z + noise.astype(bf16).astype(jnp.float32)
    d = jnp.maximum(lin(z, w3, b3), 0.0)
    return lin(d, w4, b4)


# ----------------------------------------------------------------------------
if __name__ == "__main__":
    in_channels = 16
    compressed_dim = 8
    batch = 8

    key = jax.random.PRNGKey(0)
    k_x, k_noise, k_params = jax.random.split(key, 3)

    x = jax.random.normal(k_x, (batch, in_channels), jnp.float32)
    params = init_params(k_params, in_channels, compressed_dim)
    w_slab, b_slab = pack_params(params, in_channels, compressed_dim)

    # noise ~ N(0,1) / sqrt(2 * communication_rate * SNR), as in the PyTorch module
    training_signal_noise_ratio = 5.01187
    communication_rate = 1
    noise = (jax.random.normal(k_noise, (batch, compressed_dim), jnp.float32)
             / (2 * communication_rate * training_signal_noise_ratio) ** 0.5)

    out = radio_transformer_forward(x, noise, w_slab, b_slab,
                                    in_channels, compressed_dim)
    out = jax.block_until_ready(out)

    ref = reference_forward(x, noise, params, in_channels)
    assert out.shape == (batch, in_channels)
    assert jnp.allclose(out, ref, atol=2e-2, rtol=2e-2), \
        float(jnp.max(jnp.abs(out - ref)))

    print("KERNEL_OK")
</pallas_src>

<mosaic_0001>
module attributes {stable_mosaic.version = 11 : i64} {
  func.func @rtn_kernel(%arg0: i32, %arg1: memref<24x128xbf16, #tpu.memory_space<vmem>>, %arg2: memref<64x16xbf16, #tpu.memory_space<vmem>>, %arg3: memref<64x1xf32, #tpu.memory_space<vmem>>, %arg4: memref<16x128xbf16, #tpu.memory_space<vmem>>) attributes {dimension_semantics = [#tpu.dimension_semantics<parallel>], iteration_bounds = array<i64: 1>, scalar_prefetch = 0 : i64, scratch_operands = 0 : i64, tpu.core_type = #tpu.core_type<tc>, window_params = [{transform_indices = @transform_0, window_bounds = array<i64: 24, 128>}, {pipeline_mode = #tpu.pipeline_mode<synchronous>, transform_indices = @transform_1, window_bounds = array<i64: 64, 16>}, {pipeline_mode = #tpu.pipeline_mode<synchronous>, transform_indices = @transform_2, window_bounds = array<i64: 64, 1>}, {transform_indices = @transform_3, window_bounds = array<i64: 16, 128>}]} {
    %c0 = arith.constant 0 : index
    %c0_0 = arith.constant 0 : index
    %0 = vector.load %arg2[%c0, %c0_0] : memref<64x16xbf16, #tpu.memory_space<vmem>>, vector<16x16xbf16>
    %c16 = arith.constant 16 : index
    %c0_1 = arith.constant 0 : index
    %1 = vector.load %arg2[%c16, %c0_1] : memref<64x16xbf16, #tpu.memory_space<vmem>>, vector<8x16xbf16>
    %c32 = arith.constant 32 : index
    %c0_2 = arith.constant 0 : index
    %2 = vector.load %arg2[%c32, %c0_2] : memref<64x16xbf16, #tpu.memory_space<vmem>>, vector<8x8xbf16>
    %c48 = arith.constant 48 : index
    %c0_3 = arith.constant 0 : index
    %3 = vector.load %arg2[%c48, %c0_3] : memref<64x16xbf16, #tpu.memory_space<vmem>>, vector<16x8xbf16>
    %c0_4 = arith.constant 0 : index
    %c0_5 = arith.constant 0 : index
    %4 = vector.load %arg3[%c0_4, %c0_5] : memref<64x1xf32, #tpu.memory_space<vmem>>, vector<16x1xf32>
    %c16_6 = arith.constant 16 : index
    %c0_7 = arith.constant 0 : index
    %5 = vector.load %arg3[%c16_6, %c0_7] : memref<64x1xf32, #tpu.memory_space<vmem>>, vector<8x1xf32>
    %c32_8 = arith.constant 32 : index
    %c0_9 = arith.constant 0 : index
    %6 = vector.load %arg3[%c32_8, %c0_9] : memref<64x1xf32, #tpu.memory_space<vmem>>, vector<8x1xf32>
    %c48_10 = arith.constant 48 : index
    %c0_11 = arith.constant 0 : index
    %7 = vector.load %arg3[%c48_10, %c0_11] : memref<64x1xf32, #tpu.memory_space<vmem>>, vector<16x1xf32>
    %c0_12 = arith.constant 0 : index
    %c0_13 = arith.constant 0 : index
    %8 = vector.load %arg1[%c0_12, %c0_13] : memref<24x128xbf16, #tpu.memory_space<vmem>>, vector<16x128xbf16>
    %c16_14 = arith.constant 16 : index
    %c0_15 = arith.constant 0 : index
    %9 = vector.load %arg1[%c16_14, %c0_15] : memref<24x128xbf16, #tpu.memory_space<vmem>>, vector<8x128xbf16>
    %10 = arith.extf %9 : vector<8x128xbf16> to vector<8x128xf32>
    %cst = arith.constant dense<0.000000e+00> : vector<16x128xf32>
    %11 = tpu.matmul %0, %8, %cst {dimension_numbers = #tpu.dot_dimension_numbers<[1], [0], [0], [1], [0, 0, 1, 1], [], []>} : vector<16x16xbf16>, vector<16x128xbf16>, vector<16x128xf32> -> vector<16x128xf32>
    %12 = vector.broadcast %4 : vector<16x1xf32> to vector<16x128xf32>
    %13 = arith.addf %11, %12 : vector<16x128xf32>
    %cst_16 = arith.constant 0.000000e+00 : f32
    %14 = vector.broadcast %cst_16 : f32 to vector<16x128xf32>
    %15 = arith.maximumf %13, %14 : vector<16x128xf32>
    %16 = arith.truncf %15 : vector<16x128xf32> to vector<16x128xbf16>
    %cst_17 = arith.constant dense<0.000000e+00> : vector<8x128xf32>
    %17 = tpu.matmul %1, %16, %cst_17 {dimension_numbers = #tpu.dot_dimension_numbers<[1], [0], [0], [1], [0, 0, 1, 1], [], []>} : vector<8x16xbf16>, vector<16x128xbf16>, vector<8x128xf32> -> vector<8x128xf32>
    %18 = vector.broadcast %5 : vector<8x1xf32> to vector<8x128xf32>
    %19 = arith.addf %17, %18 : vector<8x128xf32>
    %20 = arith.mulf %19, %19 : vector<8x128xf32>
    %cst_18 = arith.constant dense<0.000000e+00> : vector<128xf32>
    %21 = vector.multi_reduction <add>, %20, %cst_18 [0] : vector<8x128xf32> to vector<128xf32>
    %22 = vector.shape_cast %21 : vector<128xf32> to vector<1x128xf32>
    %23 = math.rsqrt %22 : vector<1x128xf32>
    %cst_19 = arith.constant 2.560000e+02 : f32
    %24 = vector.broadcast %cst_19 : f32 to vector<1x128xf32>
    %25 = arith.mulf %24, %23 : vector<1x128xf32>
    %26 = vector.broadcast %25 : vector<1x128xf32> to vector<8x128xf32>
    %27 = arith.mulf %19, %26 : vector<8x128xf32>
    %28 = arith.addf %27, %10 : vector<8x128xf32>
    %29 = arith.truncf %28 : vector<8x128xf32> to vector<8x128xbf16>
    %cst_20 = arith.constant dense<0.000000e+00> : vector<8x128xf32>
    %30 = tpu.matmul %2, %29, %cst_20 {dimension_numbers = #tpu.dot_dimension_numbers<[1], [0], [0], [1], [0, 0, 1, 1], [], []>} : vector<8x8xbf16>, vector<8x128xbf16>, vector<8x128xf32> -> vector<8x128xf32>
    %31 = vector.broadcast %6 : vector<8x1xf32> to vector<8x128xf32>
    %32 = arith.addf %30, %31 : vector<8x128xf32>
    %cst_21 = arith.constant 0.000000e+00 : f32
    %33 = vector.broadcast %cst_21 : f32 to vector<8x128xf32>
    %34 = arith.maximumf %32, %33 : vector<8x128xf32>
    %35 = arith.truncf %34 : vector<8x128xf32> to vector<8x128xbf16>
    %cst_22 = arith.constant dense<0.000000e+00> : vector<16x128xf32>
    %36 = tpu.matmul %3, %35, %cst_22 {dimension_numbers = #tpu.dot_dimension_numbers<[1], [0], [0], [1], [0, 0, 1, 1], [], []>} : vector<16x8xbf16>, vector<8x128xbf16>, vector<16x128xf32> -> vector<16x128xf32>
    %37 = vector.broadcast %7 : vector<16x1xf32> to vector<16x128xf32>
    %38 = arith.addf %36, %37 : vector<16x128xf32>
    %39 = arith.truncf %38 : vector<16x128xf32> to vector<16x128xbf16>
    %c0_23 = arith.constant 0 : index
    %c0_24 = arith.constant 0 : index
    %40 = vector.load %arg4[%c0_23, %c0_24] : memref<16x128xbf16, #tpu.memory_space<vmem>>, vector<16x128xbf16>
    tpu.vector_store %arg4[%c0_23, %c0_24], %39 {strides = array<i32>} : memref<16x128xbf16, #tpu.memory_space<vmem>>, vector<16x128xbf16>,
    return
  }
  func.func @transform_0(%arg0: i32) -> (i32, i32) {
    %c0_i32 = arith.constant 0 : i32
    %c0_i32_0 = arith.constant 0 : i32
    return %c0_i32, %arg0 : i32, i32
  }
  func.func @transform_1(%arg0: i32) -> (i32, i32) {
    %c0_i32 = arith.constant 0 : i32
    %c0_i32_0 = arith.constant 0 : i32
    %c0_i32_1 = arith.constant 0 : i32
    return %c0_i32, %c0_i32_0 : i32, i32
  }
  func.func @transform_2(%arg0: i32) -> (i32, i32) {
    %c0_i32 = arith.constant 0 : i32
    %c0_i32_0 = arith.constant 0 : i32
    %c0_i32_1 = arith.constant 0 : i32
    return %c0_i32, %c0_i32_0 : i32, i32
  }
  func.func @transform_3(%arg0: i32) -> (i32, i32) {
    %c0_i32 = arith.constant 0 : i32
    %c0_i32_0 = arith.constant 0 : i32
    return %c0_i32, %arg0 : i32, i32
  }
}

</mosaic_0001>

<bundles_post_ra>
// kernel: tpu_custom_call.1
= control target key start
LH: loop header
LB: loop body
LE: loop exit
PB: predicated region body
PF: predicated region fallthrough
CT: control target
= control target key end

     0   :  { %v389_v1 = vmov 0.0   ;;  %vm390_vm0 = vmmov 0   ;;  %vm53_vm1 = vcmask 130048   ;;  %v391_v4 = vmov 0   ;;  %s469_s0 = inlined_call_operand.vmem [shape: bf16[24,128], index: 0, kind: input, shape index: {}]   ;;  %s470_s1 = inlined_call_operand.vmem [shape: bf16[64,16], index: 1, kind: input, shape index: {}]   ;;  %s471_s2 = inlined_call_operand.vmem [shape: f32[64,1], index: 2, kind: input, shape index: {}]   ;;  %s472_s3 = inlined_call_operand.hbm [shape: bf16[16,128], index: 3, kind: output, shape index: {}]  }
   0x1   :  { %v360_v0 = vld [vmem:[%s469_s0] sm:$0xff]   ;;  %328 = vmatprep.subr.bf16.mxu0 %v389_v1  ;;  %334 = vmatprep.subr.bf16.mxu1 %v389_v1 }
   0x2   :  { %v361_v2 = vld [vmem:[%s470_s1] sm:$0xff]   ;;  %329 = vmatpush3.bf16.msra.mxu0 %v360_v0  ;;  %330 = vmatprep.mubr.msk.bf16.mxu0 %vm390_vm0, %v389_v1 }
   0x3   :  { %v22_v3 = vld [vmem:[%s471_s2] sm:$0xff]  ;;  %358 = vset.pattern.permute.xlu0 %v391_v4  ;;  %336 = vmatprep.mubr.msk.bf16.mxu1 %vm390_vm0, %v389_v1 }
   0x4   :  { %8 = vsyncpa [#allocation3], 0  ;;  %34 = vperm.xlu0 %358, %v22_v3   ;;  %359 = vset.pattern.permute.xlu1 %v391_v4  ;;  %v23_v5 = vld [vmem:[%s471_s2 + $0x8] sm:$0xff]  ;;  %v26_v6 = vld [vmem:[%s471_s2 + $0x30] sm:$0xff]  ;;  %vm170_vm2 = vcmask 1043456   ;;  %vm166_vm3 = vcmask 64512  }
   0x5   :  { %331 = vmatmul.mubr.msk.bf16.vlgmr.msra.gmra.mrb[0].mxu0 %vm53_vm1, %v361_v2  ;;  %340 = vmatprep.subr.bf16.mxu0 %v389_v1  ;;  %v24_v7 = vld [vmem:[%s471_s2 + $0x10] sm:$0xff]  ;;  %v25_v8 = vld [vmem:[%s471_s2 + $0x20] sm:$0xff]  ;;  %v27_v9 = vld [vmem:[%s471_s2 + $0x38] sm:$0xff]  ;;  %s392_s7 = smov [#allocation2]  }
   0x6   :  { %342 = vmatprep.mubr.msk.bf16.mxu0 %vm390_vm0, %v389_v1  ;;  %103 = vperm.xlu1 %359, %v24_v7   ;;  %v18_v21 = vld [vmem:[%s470_s1 + $0x8] sm:$0xf]  ;;  %v19_v43 = vld [vmem:[%s470_s1 + $0x10] sm:$0xf]  ;;  %v362_v53 = vld [vmem:[%s470_s1 + $0x18] sm:$0xff]   ;;  %s293_s8 = sshll.u32 %s392_s7, 4  ;;  %s294_s8 = int_to_ptr.vmem [resolvable:$true] %s293_s8 }
   0x7   :  { %v30_v35 = vld [vmem:[%s469_s0 + $0x8] sm:$0xf]  ;;  %s365_s9 = scalar_lea.vmem %s294_s8, 128  ;;  %p370_p1 = scmp.lt.s32.totalorder %s294_s8, %s294_s8 }
   0x8   :  { %39 = vperm.xlu0 %358, %v23_v5   ;;  %v31_v37 = vunpack.c.l.bf16 %v30_v35  ;;  %p366_p0 = scmp.ne.s32.totalorder %s294_s8, %s365_s9  ;;  %p371_p2 = scmp.lt.s32.totalorder %s365_s9, %s365_s9 }
   0xa   :  { %163 = vperm.xlu1 %359, %v25_v8   ;;  %p372_p3 = por %p371_p2, %p370_p1 }
   0xc   :  { %218 = vperm.xlu0 %358, %v26_v6   ;;  %p373_p4 = pnand %p372_p3, %p366_p0 }
   0xe   :  { %223 = vperm.xlu1 %359, %v27_v9  }
  0x83   :  { %v35_v10 = vpop.permute.xlu0 %34 }
  0x85   :  { %v104_v22 = vpop.permute.xlu1 %103 }
  0x87   :  { %v40_v14 = vpop.permute.xlu0 %39 }
  0x89   :  { %v164_v44 = vpop.permute.xlu1 %163 }
  0x8b   :  { %v219_v55 = vpop.permute.xlu0 %218 }
  0x8d   :  { %v224_v57 = vpop.permute.xlu1 %223 }
  0xd8   :  { %v91_v11 = vpop.f32.mrb[0].mxu0 }
  0xd9   :  { %v92_v12 = vadd.f32 %v91_v11, %v35_v10  ;;  %v332_v13 = vpop.f32.mrb[1].mxu0 }
  0xda   :  { %v94_v15 = vpop.f32.mrb[2].mxu0 }
  0xdb   :  { %v95_v16 = vadd.f32 %v94_v15, %v40_v14  ;;  %v333_v17 = vpop.f32.mrb[3].mxu0  ;;  %v98_v18 = vmax.f32 %v92_v12, 0.0 }
  0xdd   :  { %v99_v19 = vmax.f32 %v95_v16, 0.0 }
  0xdf   :  { %v100_v20 = vpack.c.bf16 %v99_v19, %v98_v18 }
  0xe1   :  { %335 = vmatpush3.bf16.msra.mxu1 %v100_v20 }
  0xe2   :  { %346 = vmatprep.subr.bf16.mxu1 %v389_v1 }
  0xe4   :  { %337 = vmatmul.mubr.msk.bf16.vlgmr.msra.gmra.mrb[0].mxu1 %vm53_vm1, %v18_v21 }
  0xe5   :  { %348 = vmatprep.mubr.msk.bf16.mxu1 %vm390_vm0, %v389_v1 }
 0x1b7   :  { %v143_v23 = vpop.f32.mrb[0].mxu1 }
 0x1b8   :  { %v144_v24 = vadd.f32 %v143_v23, %v104_v22  ;;  %v338_v25 = vpop.f32.mrb[1].mxu1 }
 0x1b9   :  { %v146_v26 = vpop.f32.mrb[2].mxu1 }
 0x1ba   :  { %v149_v27 = vmul.f32 %v144_v24, %v144_v24  ;;  %v339_v28 = vpop.f32.mrb[3].mxu1 }
 0x1bc   :  { %v150_v29 = vrot.slane %v149_v27, 4 }
 0x1be   :  { %v151_v30 = vadd.f32 %v150_v29, %v149_v27 }
 0x1c0   :  { %v152_v31 = vrot.slane %v151_v30, 2 }
 0x1c2   :  { %v153_v32 = vadd.f32 %v152_v31, %v151_v30 }
 0x1c4   :  { %v154_v33 = vrot.slane %v153_v32, 1 }
 0x1c6   :  { %v155_v34 = vadd.f32 %v154_v33, %v153_v32 }
 0x1c8   :  { %363 = vrsqrt.f32 %v155_v34 }
 0x1d2   :  { %v364_v36 = vpop.eup %363 }
 0x1d3   :  { %v157_v38 = vmul.f32 256.0, %v364_v36 }
 0x1d5   :  { %v158_v39 = vmul.f32 %v157_v38, %v144_v24 }
 0x1d7   :  { %v159_v40 = vadd.f32 %v158_v39, %v31_v37 }
 0x1d9   :  { %v160_v41 = vpack.c.bf16 %v159_v40, %v159_v40 }
 0x1db   :  { %v172_v42 = vsel %vm170_vm2, %v160_v41, 0 }
 0x1dc   :  { %341 = vmatpush3.bf16.msra.mxu0 %v172_v42 }
 0x1df   :  { %343 = vmatmul.mubr.msk.bf16.vlgmr.msra.gmra.mrb[4].mxu0 %vm166_vm3, %v19_v43 }
 0x2b2   :  { %v208_v45 = vpop.f32.mrb[4].mxu0 }
 0x2b3   :  { %v209_v46 = vadd.f32 %v208_v45, %v164_v44  ;;  %v344_v47 = vpop.f32.mrb[5].mxu0 }
 0x2b4   :  { %v211_v48 = vpop.f32.mrb[6].mxu0 }
 0x2b5   :  { %v214_v49 = vmax.f32 %v209_v46, 0.0  ;;  %v345_v50 = vpop.f32.mrb[7].mxu0 }
 0x2b7   :  { %v215_v51 = vpack.c.bf16 %v214_v49, %v214_v49 }
 0x2b9   :  { %v235_v52 = vsel %vm170_vm2, %v215_v51, 0 }
 0x2ba   :  { %347 = vmatpush3.bf16.msra.mxu1 %v235_v52 }
 0x2bd   :  { %349 = vmatmul.mubr.msk.bf16.vlgmr.msra.gmra.mrb[4].mxu1 %vm166_vm3, %v362_v53 }
 0x390   :  { %v271_v54 = vpop.f32.mrb[4].mxu1 }
 0x391   :  { %v350_v56 = vpop.f32.mrb[5].mxu1  ;;  %v272_v59 = vadd.f32 %v271_v54, %v219_v55 }
 0x392   :  { %v274_v58 = vpop.f32.mrb[6].mxu1 }
 0x393   :  { %v275_v60 = vadd.f32 %v274_v58, %v224_v57  ;;  %v351_v61 = vpop.f32.mrb[7].mxu1 }
 0x395   :  { %v318_v62 = vpack.c.bf16 %v275_v60, %v272_v59 }
 0x397   :  { %319 = vst [vmem:[#allocation2] sm:$0xff] %v318_v62  }
 0x398   :  { %376 = shalt.err (!%p373_p4)
}
 0x399   :  { %s377_s11 = scalar_lea.hbm %s472_s3, 128 }
 0x39a   :  { %p378_p5 = scmp.ne.s32.totalorder %s472_s3, %s377_s11  ;;  %p381_p6 = scmp.lt.u32.totalorder %s377_s11, %s472_s3 }
 0x39c   :  { %p383_p7 = pnand %p381_p6, %p378_p5 }
 0x39e   :  { %386 = shalt.err (!%p383_p7)
}
 0x39f   :  { %s393_s16 = smov 64   ;;  %s394_s17 = smov 4  }
 0x3a0   :  { %299 = dma.vmem_to_hbm [thread:$0]  %s294_s8, 128, %s472_s3, [#allocation3], %s393_s16, %s393_s16, %s394_s17  }
 0x3a1   :  { %387 = dma.done.wait [#allocation3], 128  }
 0x3a2   :  { %388 = vsyncadd [#allocation3], 4294967168 }
 0x3a3   :  { %303 = vsyncpa [#allocation3], 1 }

</bundles_post_ra>
